<compile_context>
chip_gen: v7x
topology: tpu7x:2x2x1
jax: 0.10.0
libtpu: 0.0.40
codegen_flags: <defaults>
</compile_context>

<pallas_src>
import jax
import jax.numpy as jnp
from jax.experimental import pallas as pl
from jax.experimental.pallas import tpu as pltpu


def _copy_kernel(x_ref, o_ref):
    # The channel shuffle is encoded in the out_spec index_map; the kernel
    # itself just moves one full, lane-dense tile (1 load + 1 unmasked store).
    o_ref[...] = x_ref[...]


def _make_shuffle_in_vmem_kernel(C, groups):
    cpg = C // groups

    def kernel(x_ref, o_ref):
        # Whole-tile load, value-level permutation, whole-tile store.
        x = x_ref[...]  # (1, C, L)
        rows = []
        for c in range(C):
            src = (c % groups) * cpg + (c // groups)
            rows.append(x[:, src:src + 1, :])
        o_ref[...] = jnp.concatenate(rows, axis=1)

    return kernel


def channel_shuffle(x, groups=2, *, target_block_bytes=1 << 20):
    """TPU Pallas equivalent of
       x.view(N, g, C//g, L).permute(0, 2, 1, 3).reshape(N, C, L)."""
    N, C, L = x.shape
    g = groups
    assert C % g == 0, "channels must be divisible by groups"
    cpg = C // g
    itemsize = x.dtype.itemsize
    cost = pl.CostEstimate(flops=0, transcendentals=0,
                           bytes_accessed=2 * N * C * L * itemsize)

    if L % 128 == 0:
        # ---------- fast path: pure BlockSpec (DMA) permutation ----------
        # x4[n, i, j, l]  = x[n, i*cpg + j, l]
        # out3[n, j, i*L + l] = x4[n, i, j, l]
        # out3.reshape(N, C, L)[n, j*g + i, l] == PyTorch output.  ✓
        x4 = x.reshape(N, g, cpg, L)  # contiguous reshape, free

        # Grow block over the batch axis toward ~target_block_bytes so each
        # grid step moves a large lane-dense slab (amortizes ~0.35 µs/step).
        unit = cpg * L * itemsize
        bn = 1
        for d in range(1, N + 1):
            if N % d == 0 and d * unit <= target_block_bytes:
                bn = d

        out3 = pl.pallas_call(
            _copy_kernel,
            out_shape=jax.ShapeDtypeStruct((N, cpg, g * L), x.dtype),
            grid=(N // bn, g),
            in_specs=[
                # kernel ref: (bn, cpg, L); covers x4[n*bn:(n+1)*bn, i, :, :]
                pl.BlockSpec((bn, None, cpg, L), lambda n, i: (n, i, 0, 0)),
            ],
            # kernel ref: (bn, cpg, L); writes out3[n*bn:(n+1)*bn, :, i*L:(i+1)*L]
            out_specs=pl.BlockSpec((bn, cpg, L), lambda n, i: (n, 0, i)),
            compiler_params=pltpu.CompilerParams(
                dimension_semantics=("parallel", "parallel")),
            cost_estimate=cost,
        )(x4)
        return out3.reshape(N, C, L)

    # ---------- fallback: in-VMEM whole-tile permutation ----------
    # TODO(synk): only reached for L not a multiple of 128; blocks stay full
    # (C, L) so the (8,128) constraint is always satisfied.
    kernel = _make_shuffle_in_vmem_kernel(C, g)
    return pl.pallas_call(
        kernel,
        out_shape=jax.ShapeDtypeStruct((N, C, L), x.dtype),
        grid=(N,),
        in_specs=[pl.BlockSpec((1, C, L), lambda n: (n, 0, 0))],
        out_specs=pl.BlockSpec((1, C, L), lambda n: (n, 0, 0)),
        compiler_params=pltpu.CompilerParams(
            dimension_semantics=("parallel",)),
        cost_estimate=cost,
    )(x)


def channel_shuffle_ref(x, groups=2):
    # Pure-JAX reference mirroring the PyTorch forward exactly.
    N, C, L = x.shape
    return jnp.transpose(
        x.reshape(N, groups, C // groups, L), (0, 2, 1, 3)
    ).reshape(N, C, L)


if __name__ == "__main__":
    # Config 1: module default (groups=2), small lane-aligned shape.
    N, C, L = 2, 4, 128
    x = jax.random.normal(jax.random.PRNGKey(0), (N, C, L), dtype=jnp.float32)
    y = jax.block_until_ready(channel_shuffle(x, groups=2))
    assert y.shape == (N, C, L)
    assert jnp.array_equal(y, channel_shuffle_ref(x, groups=2)), \
        "channel_shuffle kernel mismatch vs reference (groups=2)"

    # Config 2: more channels / groups, multi-step grid, still lane-aligned.
    x2 = jax.random.normal(jax.random.PRNGKey(1), (2, 8, 256), dtype=jnp.float32)
    y2 = jax.block_until_ready(channel_shuffle(x2, groups=4))
    assert jnp.array_equal(y2, channel_shuffle_ref(x2, groups=4)), \
        "channel_shuffle kernel mismatch vs reference (groups=4)"

    print("KERNEL_OK")
</pallas_src>

<mosaic_0001>
module attributes {stable_mosaic.version = 11 : i64} {
  func.func @_copy_kernel(%arg0: i32, %arg1: i32, %arg2: memref<2x1x2x128xf32, #tpu.memory_space<vmem>>, %arg3: memref<2x2x128xf32, #tpu.memory_space<vmem>>) attributes {dimension_semantics = [#tpu.dimension_semantics<parallel>, #tpu.dimension_semantics<parallel>], iteration_bounds = array<i64: 1, 2>, scalar_prefetch = 0 : i64, scratch_operands = 0 : i64, tpu.core_type = #tpu.core_type<tc>, window_params = [{transform_indices = @transform_0, window_bounds = array<i64: 2, 1, 2, 128>}, {transform_indices = @transform_1, window_bounds = array<i64: 2, 2, 128>}]} {
    %c0 = arith.constant 0 : index
    %c0_0 = arith.constant 0 : index
    %c0_1 = arith.constant 0 : index
    %c0_2 = arith.constant 0 : index
    %0 = vector.load %arg2[%c0, %c0_0, %c0_1, %c0_2] : memref<2x1x2x128xf32, #tpu.memory_space<vmem>>, vector<2x1x2x128xf32>
    %1 = vector.shape_cast %0 : vector<2x1x2x128xf32> to vector<2x2x128xf32>
    %c0_3 = arith.constant 0 : index
    %c0_4 = arith.constant 0 : index
    %c0_5 = arith.constant 0 : index
    %2 = vector.load %arg3[%c0_3, %c0_4, %c0_5] : memref<2x2x128xf32, #tpu.memory_space<vmem>>, vector<2x2x128xf32>
    tpu.vector_store %arg3[%c0_3, %c0_4, %c0_5], %1 {strides = array<i32>} : memref<2x2x128xf32, #tpu.memory_space<vmem>>, vector<2x2x128xf32>,
    return
  }
  func.func @transform_0(%arg0: i32, %arg1: i32) -> (i32, i32, i32, i32) {
    %c0_i32 = arith.constant 0 : i32
    %c0_i32_0 = arith.constant 0 : i32
    %c0_i32_1 = arith.constant 0 : i32
    return %arg0, %arg1, %c0_i32, %c0_i32_0 : i32, i32, i32, i32
  }
  func.func @transform_1(%arg0: i32, %arg1: i32) -> (i32, i32, i32) {
    %c0_i32 = arith.constant 0 : i32
    %c0_i32_0 = arith.constant 0 : i32
    return %arg0, %c0_i32, %arg1 : i32, i32, i32
  }
}

</mosaic_0001>

<bundles_post_ra>
// kernel: tpu_custom_call.1
= control target key start
LH: loop header
LB: loop body
LE: loop exit
PB: predicated region body
PF: predicated region fallthrough
CT: control target
= control target key end

     0   :  { %6 = vsyncpa [#allocation3], 0  ;;  %s646_s0 = inlined_call_operand.hbm [shape: f32[2,2,2,128], index: 0, kind: input, shape index: {}]   ;;  %s647_s1 = inlined_call_operand.hbm [shape: f32[2,2,256], index: 1, kind: output, shape index: {}]  }
   0x1   :  { %8 = vsyncpa [#allocation3 + $0x1], 0 }
   0x2   :  { %9 = vsyncpa [#allocation4], 0 }
   0x3   :  { %11 = vsyncpa [#allocation4 + $0x1], 0  ;;  %s473_s6 = smov 0   ;;  %s475_s7 = smov 0  }
   0x4   :  { %s477_s8 = smov 0   ;;  %s479_s9 = smov 0  }
   0x5   :  { %s481_s10 = smov 0   ;;  %s483_s11 = smov 0  }
   0x6 LB: > { %s260_s12 = sadd.s32 4294967295, %s453_s11   ;;  %s261_s13 = sadd.s32 4294967294, %s453_s11   ;;  %s453_s11 = sphi %s483_s11, %s17_s11   ;;  %s449_s10 = sphi %s481_s10, %s661_s10   ;;  %s445_s9 = sphi %s479_s9, %s660_s9   ;;  %s441_s8 = sphi %s477_s8, %s659_s8   ;;  %s437_s7 = sphi %s475_s7, %s658_s7   ;;  %s433_s6 = sphi %s473_s6, %s657_s6  }
   0x7   : > { %s26_s14 = sadd.s32 1, %s449_s10  ;;  %s38_s15 = sadd.s32 1, %s441_s8 }
   0x8   : > { %p27_p0 = scmp.ge.s32.totalorder %s26_s14, 2  ;;  %p45_p1 = scmp.ne.s32.totalorder %s441_s8, %s437_s7 }
   0x9   : > { %p46_p2 = scmp.eq.s32.totalorder %s453_s11, 0  ;;  %p51_p3 = scmp.ne.s32.totalorder %s437_s7, %s433_s6 }
   0xa   : > { %s663_s14 = smov (%p27_p0, %s26_s14), 0  ;;  %p52_p5 = scmp.eq.s32.totalorder %s260_s12, 0 }
   0xb   : > { %p514_p4 = por %p46_p2, %p45_p1  ;;  %s34_s17 = ssub.s32 %s449_s10, %s663_s14 }
   0xc   : > { %p77_p6 = scmp.eq.s32.totalorder %s260_s12, 1  ;;  %p36_p7 = scmp.eq.s32.totalorder %s34_s17, 0 }
   0xd   : > { %p520_p8 = por %p52_p5, %p51_p3  ;;  %p83_p10 = scmp.eq.s32.totalorder %s261_s13, 1 }
   0xe   : > { %p524_p9 = por %p77_p6, %p45_p1  ;;  %p285_p13 = scmp.lt.s32.totalorder %s453_s11, 2 }
   0xf   : > { %s529_s20 = scalar_select %p36_p7, %s441_s8, %s38_s15  }
  0x10   : > { %s651_s19 = scalar_select %p524_p9, 1, 0 }
  0x11   : > { %p531_p11 = por %p83_p10, %p51_p3  ;;  %s103_s22 = sand.u32 1, %s441_s8  }
  0x12   : > { %s264_s23 = sshll.u32 %s103_s22, 2  ;;  %s265_s24 = sshll.u32 %s449_s10, 5 }
  0x13   : > { %s652_s21 = scalar_select %p531_p11, 1, 0 }
  0x14   : > { %s542_s27 = scalar_lea.hbm %s646_s0, %s265_s24  ;;  %s107_s28 = scalar_lea.vmem [#allocation2], %s264_s23 }
  0x15   : > { %s116_s29 = sshll.u32 %s107_s28, 4  ;;  %p548_p0 = pnand %p285_p13, %p514_p4  ;;  %s544_s29 = int_to_ptr.vmem [resolvable:$true] %s116_s29 }
  0x16   : > { %s552_s2 = scalar_lea.sflag [#allocation3], %s103_s22  ;;  %s341_s3 = scalar_lea.hbm %s542_s27, 64 }
  0x17   : > { %p342_p1 = scmp.ne.s32.totalorder %s542_s27, %s341_s3  ;;  %p343_p2 = pneg %p548_p0 }
  0x18   : > { %s346_s12 = scalar_lea.hbm %s646_s0, 128  ;;  %p347_p4 = scmp.lt.u32.totalorder %s542_s27, %s646_s0 }
  0x19   : > { %p344_p3 = pnand %p343_p2, %p342_p1  ;;  %p348_p6 = scmp.lt.u32.totalorder %s346_s12, %s341_s3 }
  0x1a   : > { %p350_p10 = scmp.lt.u32.totalorder %s341_s3, %s542_s27 }
  0x1b   : > { %p345_p5 = pneg %p344_p3  ;;  %p349_p7 = por %p348_p6, %p347_p4 }
  0x1d   : > { %p351_p13 = por %p350_p10, %p349_p7 }
  0x1f   : > { %p352_p12 = pnand %p351_p13, %p345_p5 }
  0x21   : > { %355 = shalt.err (!%p352_p12)
}
  0x22   : > { %s356_s16 = scalar_lea.vmem %s544_s29, 64  ;;  %s455_s17 = smov [#allocation2]  }
  0x23   : > { %p357_p1 = scmp.ne.s32.totalorder %s544_s29, %s356_s16  ;;  %s361_s22 = sshll.u32 %s455_s17, 4  ;;  %s362_s22 = int_to_ptr.vmem [resolvable:$false] %s361_s22 }
  0x24   : > { %s363_s23 = scalar_lea.vmem %s362_s22, 128  ;;  %p364_p9 = scmp.lt.s32.totalorder %s544_s29, %s362_s22 }
  0x25   : > { %p359_p3 = pnand %p357_p1, %p343_p2  ;;  %p365_p4 = scmp.lt.s32.totalorder %s363_s23, %s356_s16 }
  0x27   : > { %p360_p11 = pneg %p359_p3  ;;  %p366_p6 = por %p365_p4, %p364_p9 }
  0x29   : > { %p367_p7 = pnand %p366_p6, %p360_p11 }
  0x2b   : > { %370 = shalt.err (!%p367_p7)
}
  0x2c   : > { %s456_s24 = smov 64   ;;  %s457_s25 = smov 32  }
  0x2d   : > { %s458_s26 = smov 2   ;;  %p266_p12 = scmp.ge.s32.totalorder %s453_s11, 1 }
  0x2e   : > { %280 = dma.hbm_to_vmem [thread:$0]  (!%p548_p0), %s542_s27, 64, %s544_s29, %s552_s2, %s456_s24, %s457_s25, %s458_s26  }
  0x2f   : > { %p124_p2 = scmp.lt.s32.totalorder %s453_s11, 3 }
  0x31   : > { %p125_p5 = pnand %p266_p12, %p124_p2 }
  0x32   : > { %s583_s28 = sand.u32 (!%p125_p5), 1, %s437_s7  }
  0x33   : > { %128 = sbr.rel (%p125_p5) target bundleno = 87 (0x57), region = 24  ;;  %s267_s3 = sshll.u32 (!%p125_p5), %s583_s28, 2 }
  0x34   : > { %s131_s4 = scalar_lea.sflag (!%p125_p5), [#allocation3], %s583_s28  ;;  %s134_s5 = scalar_lea.vmem (!%p125_p5), [#allocation2], %s267_s3 }
  0x3a   : > { %424 = dma.done.wait (%p520_p8), %s131_s4, 64  }
  0x3b   : > { %426 = vsyncadd (%p520_p8), %s131_s4, 4294967232  ;;  %s152_s27 = scalar_lea.vmem [#allocation5], %s267_s3  ;;  %s270_s30 = sshll.u32 %s445_s9, 5  ;;  %v155_v0 = vld [vmem:[%s134_s5] sm:$0xf]  }
  0x3c   : > { %s175_s29 = sshll.u32 %s152_s27, 4  ;;  %s597_s13 = scalar_lea.hbm %s647_s1, %s270_s30  ;;  %157 = vst [vmem:[%s152_s27] sm:$0xf] %v155_v0   ;;  %s592_s29 = int_to_ptr.vmem [resolvable:$true] %s175_s29 }
  0x3d   : > { %s160_s18 = scalar_lea.sflag [#allocation4], %s583_s28  ;;  %s371_s15 = scalar_lea.vmem %s592_s29, 64 }
  0x3e   : > { %p372_p8 = scmp.ne.s32.totalorder %s592_s29, %s371_s15  ;;  %p654_p9 = scmp.ne.s32.totalorder %s651_s19, 0 }
  0x3f   : > { %s459_s16 = smov [#allocation5]  }
  0x40   : > { %p373_p11 = pnand %p372_p8, %p654_p9  ;;  %s375_s9 = sshll.u32 %s459_s16, 4  ;;  %s376_s9 = int_to_ptr.vmem [resolvable:$false] %s375_s9 }
  0x41   : > { %s377_s17 = scalar_lea.vmem %s376_s9, 128  ;;  %p378_p10 = scmp.lt.s32.totalorder %s592_s29, %s376_s9 }
  0x42   : > { %p374_p0 = pneg %p373_p11  ;;  %p379_p13 = scmp.lt.s32.totalorder %s377_s17, %s371_s15 }
  0x44   : > { %p380_p1 = por %p379_p13, %p378_p10 }
  0x46   : > { %p381_p3 = pnand %p380_p1, %p374_p0 }
  0x48   : > { %384 = shalt.err (!%p381_p3)
}
  0x49   : > { %s385_s22 = scalar_lea.hbm %s597_s13, 64  ;;  %s389_s25 = scalar_lea.hbm %s647_s1, 128 }
  0x4a   : > { %p386_p4 = scmp.ne.s32.totalorder %s597_s13, %s385_s22  ;;  %p390_p12 = scmp.lt.u32.totalorder %s597_s13, %s647_s1 }
  0x4b   : > { %p391_p2 = scmp.lt.u32.totalorder %s389_s25, %s385_s22  ;;  %p393_p8 = scmp.lt.u32.totalorder %s385_s22, %s597_s13 }
  0x4c   : > { %p387_p6 = pnand %p386_p4, %p654_p9 }
  0x4d   : > { %p392_p5 = por %p391_p2, %p390_p12 }
  0x4e   : > { %p388_p7 = pneg %p387_p6 }
  0x4f   : > { %p394_p11 = por %p393_p8, %p392_p5 }
  0x51   : > { %p395_p0 = pnand %p394_p11, %p388_p7 }
  0x53   : > { %398 = shalt.err (!%p395_p0)
}
  0x54   : > { %s460_s4 = smov 32   ;;  %s461_s5 = smov 64  }
  0x55   : > { %s462_s27 = smov 2  }
  0x56   : > { %275 = dma.vmem_to_hbm [thread:$0]  (%p654_p9), %s592_s29, 64, %s597_s13, %s160_s18, %s460_s4, %s461_s5, %s462_s27  }
  0x57 PF: > { %s190_s30 = sand.u32 1, %s433_s6   ;;  %p655_p10 = scmp.ne.s32.totalorder %s652_s21, 0 }
  0x58   : > { %p656_p13 = scmp.ge.s32.totalorder %s453_s11, 2  ;;  %s191_s2 = scalar_lea.sflag [#allocation4], %s190_s30 }
  0x5a   : > { %p282_p1 = pnand %p656_p13, %p655_p10 }
  0x5c   : > { %428 = dma.done.wait (!%p282_p1), %s191_s2, 64  }
  0x5d   : > { %430 = vsyncadd (!%p282_p1), %s191_s2, 4294967232  ;;  %s17_s11 = sadd.s32 1, %s453_s11   ;;  %s657_s6 = smov %s437_s7 }
  0x5e   : > { %p14_p3 = scmp.ge.s32.totalorder %s17_s11, 4   ;;  %s658_s7 = smov %s441_s8 }
  0x5f   : > { %s659_s8 = smov %s529_s20  ;;  %s660_s9 = smov %s449_s10 }
  0x60   : > { %s661_s10 = smov %s663_s14  ;;  %16 = sbr.rel (!%p14_p3) target bundleno = 6 (0x6), region = 69 }
  0x67   :  { %196 = vsyncpa [#allocation3], 1 }
  0x68   :  { %198 = vsyncpa [#allocation3 + $0x1], 1 }
  0x69   :  { %199 = vsyncpa [#allocation4], 1 }
  0x6a   :  { %201 = vsyncpa [#allocation4 + $0x1], 1 }

</bundles_post_ra>
